<compile_context>
chip_gen: v6e
topology: v6e:2x2x1
jax: 0.10.0
libtpu: 0.0.40
codegen_flags: <defaults>
</compile_context>

<pallas_src>
import jax
import jax.numpy as jnp
from jax.experimental import pallas as pl
from jax.experimental.pallas import tpu as pltpu


def mlp_kernel(x_ref, w1_ref, b1_ref, w2_ref, b2_ref, o_ref):
    # layer 1 on the MXU: in-kernel f32 -> bf16 cast of x (VPU slot, free here),
    # f32 accumulation, bias + ReLU in f32.
    x_bf = x_ref[...].astype(jnp.bfloat16)
    h = jnp.dot(x_bf, w1_ref[...], preferred_element_type=jnp.float32)
    h = jnp.maximum(h + b1_ref[...], 0.0)
    # layer 2 (N == 1): VPU multiply + lane reduction; b2 is a scalar from SMEM.
    z = jnp.sum(h * w2_ref[...], axis=-1, keepdims=True) + b2_ref[0, 0]
    o_ref[...] = jax.nn.sigmoid(z).astype(o_ref.dtype)


def _round_up(v, m):
    return ((v + m - 1) // m) * m


def act_2_forward(x, w1, b1, w2, b2, *, max_tile_rows=1024,
                  vmem_budget_bytes=48 * 1024 * 1024):
    """x: (B, input_size); w1: (input_size, hidden); b1: (1, hidden);
    w2: (hidden, 1); b2: (1, 1)  ->  (B, 1) float32."""
    B, input_size = x.shape
    hidden = w1.shape[1]

    # ---- batch tile selection ----------------------------------------------
    # Sublane-align the user cap so the (tb, input_size) BlockSpec always lowers.
    max_tile_rows = max(8, _round_up(max_tile_rows, 8))

    # VMEM-aware cap: double-buffered f32 x tiles + double-buffered out tiles plus
    # the resident bf16 w1 / f32 bias rows must stay inside the budget
    # (v7x only has 64 MiB physical VMEM; v5e/v6e have 128 MiB).
    resident_bytes = input_size * hidden * 2 + 2 * hidden * 4 + (1 << 20)  # w1 + b1/w2 + slack
    per_row_bytes = 2 * input_size * 4 + 2 * 1 * 4                          # x + out, double-buffered
    avail = max(vmem_budget_bytes - resident_bytes, per_row_bytes * 8)
    vmem_cap = max(8, (avail // per_row_bytes) // 8 * 8)

    if B <= 8:
        tb = B                                    # full-array block; no (8,128) constraint
    else:
        tb = _round_up(pl.cdiv(B, 2), 8)          # guarantee >= 2 grid steps (both v7x TCs)
        tb = min(tb, max_tile_rows, vmem_cap)
    grid = (pl.cdiv(B, tb),)

    # ---- operand prep ---------------------------------------------------------
    # x stays f32 (cast happens in-kernel); w1 is pre-cast bf16 since it is DMA'd once.
    w1_bf = w1.astype(jnp.bfloat16)
    b1_row = b1.reshape(1, hidden).astype(jnp.float32)
    w2_row = w2.reshape(1, hidden).astype(jnp.float32)
    b2_s = b2.reshape(1, 1).astype(jnp.float32)

    return pl.pallas_call(
        mlp_kernel,
        out_shape=jax.ShapeDtypeStruct((B, 1), jnp.float32),
        grid=grid,
        in_specs=[
            # x: tiled over batch -> Pallas auto double-buffers the HBM DMAs.
            pl.BlockSpec((tb, input_size), lambda i: (i, 0)),
            # Weights / biases: constant index_map -> DMA'd once, VMEM-resident.
            pl.BlockSpec((input_size, hidden), lambda i: (0, 0)),
            pl.BlockSpec((1, hidden), lambda i: (0, 0)),
            pl.BlockSpec((1, hidden), lambda i: (0, 0)),
            # Scalar bias in SMEM (no VMEM tile / vreg broadcast needed).
            pl.BlockSpec(memory_space=pltpu.MemorySpace.SMEM),
        ],
        out_specs=pl.BlockSpec((tb, 1), lambda i: (i, 0)),
        compiler_params=pltpu.CompilerParams(
            dimension_semantics=("parallel",),   # megacore sharding on v7x; no-op v5e/v6e
            vmem_limit_bytes=vmem_budget_bytes,  # explicit budget with v7x headroom
        ),
    )(x.astype(jnp.float32), w1_bf, b1_row, w2_row, b2_s)


def init_params(key, input_size, hidden_size):
    # Deterministic init mimicking nn.Linear's uniform(-1/sqrt(fan_in), 1/sqrt(fan_in)).
    k1, k2, k3, k4 = jax.random.split(key, 4)
    bound1 = 1.0 / jnp.sqrt(input_size)
    bound2 = 1.0 / jnp.sqrt(hidden_size)
    w1 = jax.random.uniform(k1, (input_size, hidden_size), jnp.float32, -bound1, bound1)
    b1 = jax.random.uniform(k2, (1, hidden_size), jnp.float32, -bound1, bound1)
    w2 = jax.random.uniform(k3, (hidden_size, 1), jnp.float32, -bound2, bound2)
    b2 = jax.random.uniform(k4, (1, 1), jnp.float32, -bound2, bound2)
    return w1, b1, w2, b2


def _ref(x, w1, b1, w2, b2):
    return jax.nn.sigmoid(jnp.maximum(x @ w1 + b1, 0.0) @ w2 + b2)


if __name__ == "__main__":
    key = jax.random.PRNGKey(0)
    input_size, hidden_size = 32, 32
    kx, kx2, kp = jax.random.split(key, 3)
    w1, b1, w2, b2 = init_params(kp, input_size, hidden_size)

    # Case 1: tiny batch (single-step grid, full-array block).
    x_small = jax.random.normal(kx, (8, input_size), jnp.float32)
    out_small = act_2_forward(x_small, w1, b1, w2, b2)
    jax.block_until_ready(out_small)
    ref_small = _ref(x_small, w1, b1, w2, b2)
    assert out_small.shape == (8, 1)
    assert jnp.allclose(out_small, ref_small, atol=2e-2), "mismatch vs reference (small)"

    # Case 2: batch that exercises the multi-step grid + boundary-padded tile path.
    x_big = jax.random.normal(kx2, (24, input_size), jnp.float32)
    out_big = act_2_forward(x_big, w1, b1, w2, b2)
    jax.block_until_ready(out_big)
    ref_big = _ref(x_big, w1, b1, w2, b2)
    assert out_big.shape == (24, 1)
    assert jnp.allclose(out_big, ref_big, atol=2e-2), "mismatch vs reference (tiled)"

    print("KERNEL_OK")
</pallas_src>

<mosaic_0001>
module attributes {stable_mosaic.version = 11 : i64} {
  func.func @mlp_kernel(%arg0: i32, %arg1: memref<8x32xf32, #tpu.memory_space<vmem>>, %arg2: memref<32x32xbf16, #tpu.memory_space<vmem>>, %arg3: memref<1x32xf32, #tpu.memory_space<vmem>>, %arg4: memref<1x32xf32, #tpu.memory_space<vmem>>, %arg5: memref<1x1xf32, #tpu.memory_space<smem>>, %arg6: memref<8x1xf32, #tpu.memory_space<vmem>>) attributes {dimension_semantics = [#tpu.dimension_semantics<parallel>], iteration_bounds = array<i64: 1>, scalar_prefetch = 0 : i64, scratch_operands = 0 : i64, tpu.core_type = #tpu.core_type<tc>, window_params = [{transform_indices = @transform_0, window_bounds = array<i64: 8, 32>}, {pipeline_mode = #tpu.pipeline_mode<synchronous>, transform_indices = @transform_1, window_bounds = array<i64: 32, 32>}, {pipeline_mode = #tpu.pipeline_mode<synchronous>, transform_indices = @transform_2, window_bounds = array<i64: 1, 32>}, {pipeline_mode = #tpu.pipeline_mode<synchronous>, transform_indices = @transform_3, window_bounds = array<i64: 1, 32>}, {transform_indices = @transform_4, window_bounds = array<i64: 1, 1>}, {transform_indices = @transform_5, window_bounds = array<i64: 8, 1>}]} {
    %c0 = arith.constant 0 : index
    %c0_0 = arith.constant 0 : index
    %0 = vector.load %arg1[%c0, %c0_0] : memref<8x32xf32, #tpu.memory_space<vmem>>, vector<8x32xf32>
    %1 = arith.truncf %0 : vector<8x32xf32> to vector<8x32xbf16>
    %c0_1 = arith.constant 0 : index
    %c0_2 = arith.constant 0 : index
    %2 = vector.load %arg2[%c0_1, %c0_2] : memref<32x32xbf16, #tpu.memory_space<vmem>>, vector<32x32xbf16>
    %cst = arith.constant dense<0.000000e+00> : vector<8x32xf32>
    %3 = tpu.matmul %1, %2, %cst {dimension_numbers = #tpu.dot_dimension_numbers<[1], [0], [0], [1], [0, 0, 1, 1], [], []>} : vector<8x32xbf16>, vector<32x32xbf16>, vector<8x32xf32> -> vector<8x32xf32>
    %c0_3 = arith.constant 0 : index
    %c0_4 = arith.constant 0 : index
    %4 = vector.load %arg3[%c0_3, %c0_4] : memref<1x32xf32, #tpu.memory_space<vmem>>, vector<1x32xf32>
    %5 = vector.broadcast %4 : vector<1x32xf32> to vector<8x32xf32>
    %6 = arith.addf %3, %5 : vector<8x32xf32>
    %cst_5 = arith.constant 0.000000e+00 : f32
    %7 = vector.broadcast %cst_5 : f32 to vector<8x32xf32>
    %8 = arith.maximumf %6, %7 : vector<8x32xf32>
    %c0_6 = arith.constant 0 : index
    %c0_7 = arith.constant 0 : index
    %9 = vector.load %arg4[%c0_6, %c0_7] : memref<1x32xf32, #tpu.memory_space<vmem>>, vector<1x32xf32>
    %10 = vector.broadcast %9 : vector<1x32xf32> to vector<8x32xf32>
    %11 = arith.mulf %8, %10 : vector<8x32xf32>
    %cst_8 = arith.constant dense<0.000000e+00> : vector<8xf32>
    %12 = vector.multi_reduction <add>, %11, %cst_8 [1] : vector<8x32xf32> to vector<8xf32>
    %13 = vector.shape_cast %12 : vector<8xf32> to vector<8x1xf32>
    %c0_9 = arith.constant 0 : index
    %c0_10 = arith.constant 0 : index
    %14 = memref.load %arg5[%c0_9, %c0_10] : memref<1x1xf32, #tpu.memory_space<smem>>
    %15 = vector.broadcast %14 : f32 to vector<8x1xf32>
    %16 = arith.addf %13, %15 : vector<8x1xf32>
    %17 = arith.negf %16 : vector<8x1xf32>
    %18 = math.exp %17 : vector<8x1xf32>
    %cst_11 = arith.constant 1.000000e+00 : f32
    %19 = vector.broadcast %cst_11 : f32 to vector<8x1xf32>
    %20 = arith.addf %19, %18 : vector<8x1xf32>
    %21 = arith.divf %19, %20 : vector<8x1xf32>
    %c0_12 = arith.constant 0 : index
    %c0_13 = arith.constant 0 : index
    %22 = vector.load %arg6[%c0_12, %c0_13] : memref<8x1xf32, #tpu.memory_space<vmem>>, vector<8x1xf32>
    tpu.vector_store %arg6[%c0_12, %c0_13], %21 {strides = array<i32>} : memref<8x1xf32, #tpu.memory_space<vmem>>, vector<8x1xf32>,
    return
  }
  func.func @transform_0(%arg0: i32) -> (i32, i32) {
    %c0_i32 = arith.constant 0 : i32
    %c0_i32_0 = arith.constant 0 : i32
    return %arg0, %c0_i32 : i32, i32
  }
  func.func @transform_1(%arg0: i32) -> (i32, i32) {
    %c0_i32 = arith.constant 0 : i32
    %c0_i32_0 = arith.constant 0 : i32
    %c0_i32_1 = arith.constant 0 : i32
    return %c0_i32, %c0_i32_0 : i32, i32
  }
  func.func @transform_2(%arg0: i32) -> (i32, i32) {
    %c0_i32 = arith.constant 0 : i32
    %c0_i32_0 = arith.constant 0 : i32
    %c0_i32_1 = arith.constant 0 : i32
    return %c0_i32, %c0_i32_0 : i32, i32
  }
  func.func @transform_3(%arg0: i32) -> (i32, i32) {
    %c0_i32 = arith.constant 0 : i32
    %c0_i32_0 = arith.constant 0 : i32
    %c0_i32_1 = arith.constant 0 : i32
    return %c0_i32, %c0_i32_0 : i32, i32
  }
  func.func @transform_4(%arg0: i32) -> (i32, i32) {
    %c0_i32 = arith.constant 0 : i32
    %c0_i32_0 = arith.constant 0 : i32
    %c0_i32_1 = arith.constant 0 : i32
    return %c0_i32, %c0_i32_0 : i32, i32
  }
  func.func @transform_5(%arg0: i32) -> (i32, i32) {
    %c0_i32 = arith.constant 0 : i32
    %c0_i32_0 = arith.constant 0 : i32
    return %arg0, %c0_i32 : i32, i32
  }
}

</mosaic_0001>

<bundles_post_ra>
// kernel: tpu_custom_call.1
= control target key start
LH: loop header
LB: loop body
LE: loop exit
PB: predicated region body
PF: predicated region fallthrough
CT: control target
= control target key end

     0   :  { %11 = vsyncpa [#allocation4], 0  ;;  %s273_s0 = inlined_call_operand.hbm [shape: f32[8,32], index: 0, kind: input, shape index: {}]   ;;  %s274_s1 = inlined_call_operand.hbm [shape: bf16[32,32], index: 1, kind: input, shape index: {}]   ;;  %s275_s2 = inlined_call_operand.vmem [shape: f32[1,32], index: 2, kind: input, shape index: {}]   ;;  %s276_s3 = inlined_call_operand.vmem [shape: f32[1,32], index: 3, kind: input, shape index: {}]   ;;  %s277_s4 = inlined_call_operand.<no memory space> [shape: f32[1,1], index: 4, kind: input, shape index: {}]   ;;  %s278_s5 = inlined_call_operand.vmem [shape: f32[8,1], index: 5, kind: output, shape index: {}]  }
   0x1   :  { %12 = vsyncpa [#allocation6], 0  ;;  %s219_s18 = smov [#allocation3]   ;;  %s220_s20 = smov [#allocation5]  }
   0x2   :  { %s19_s19 = sshll.u32 %s219_s18, 4  ;;  %s28_s21 = sshll.u32 %s220_s20, 4  ;;  %s20_s19 = int_to_ptr.vmem [resolvable:$true] %s19_s19  ;;  %s29_s21 = int_to_ptr.vmem [resolvable:$true] %s28_s21 }
   0x3   :  { %s183_s22 = scalar_lea.vmem %s20_s19, 128  ;;  %p188_p1 = scmp.lt.s32.totalorder %s20_s19, %s20_s19 }
   0x4   :  { %p184_p0 = scmp.ne.s32.totalorder %s20_s19, %s183_s22  ;;  %p189_p2 = scmp.lt.s32.totalorder %s183_s22, %s183_s22 }
   0x6   :  { %p190_p3 = por %p189_p2, %p188_p1 }
   0x8   :  { %p191_p4 = pnand %p190_p3, %p184_p0 }
   0xa   :  { %194 = shalt.err (!%p191_p4)
}
   0xb   :  { %22 = dma.hbm_to_vmem [thread:$0]  %s273_s0, 128, %s20_s19, [#allocation4]  }
   0xc   :  { %s203_s25 = scalar_lea.vmem %s29_s21, 256  ;;  %p208_p6 = scmp.lt.s32.totalorder %s29_s21, %s29_s21 }
   0xd   :  { %p204_p5 = scmp.ne.s32.totalorder %s29_s21, %s203_s25  ;;  %p209_p7 = scmp.lt.s32.totalorder %s203_s25, %s203_s25 }
   0xf   :  { %p210_p8 = por %p209_p7, %p208_p6 }
  0x11   :  { %p211_p9 = pnand %p210_p8, %p204_p5 }
  0x13   :  { %214 = shalt.err (!%p211_p9)
}
  0x14   :  { %s221_s26 = smov 64   ;;  %s222_s27 = smov 4  }
  0x15   :  { %34 = dma.hbm_to_vmem [thread:$0]  %s274_s1, 256, %s29_s21, [#allocation6], %s221_s26, %s221_s26, %s222_s27  }
  0x16   :  { %215 = dma.done.wait [#allocation4], 128  }
  0x17   :  { %216 = vsyncadd [#allocation4], 4294967168 }
  0x18   :  { %217 = dma.done.wait [#allocation6], 256  }
  0x19   :  { %218 = vsyncadd [#allocation6], 4294967040  ;;  %v223_v0 = vmov 0.0   ;;  %vm224_vm0 = vmmov 0   ;;  %v169_v1 = vld [vmem:[#allocation5 + $0x8] sm:$0xff]   ;;  %v170_v2 = vld [vmem:[#allocation5] sm:$0xff]   ;;  %v130_v15 = vstv %s277_s4 }
  0x1a   :  { %155 = vmatprep.subr.bf16.mxu0 %v223_v0  ;;  %159 = vmatprep.mubr.msk.bf16.mxu0 %vm224_vm0, %v223_v0  ;;  %v48_v3 = vld [vmem:[#allocation3] sm:$0xff]  ;;  %vm73_vm1 = vcmask 261120   ;;  %vm138_vm2 = vcmask 7168  }
  0x1b   :  { %156 = vmatpush3.bf16.msra.mxu0 %v169_v1  ;;  %v49_v4 = vpack.c.bf16 %v48_v3, %v48_v3  ;;  %v146_v5 = vld [vmem:[%s275_s2] ss:$0 sm:$0xff] }
  0x1c   :  { %157 = vmatprep.subr.bf16.mxu0 %v223_v0  ;;  %v150_v9 = vld [vmem:[%s276_s3] ss:$0 sm:$0xff] }
  0x1f   :  { %158 = vmatpush3.bf16.msra.mxu0 %v170_v2 }
  0x22   :  { %160 = vmatmul.mubr.msk.bf16.vlgmr.msra.gmra.mxu0 %vm73_vm1, %v49_v4 }
  0xe2   :  { %v111_v6 = vpop.f32.mrf.mxu0 }
  0xe3   :  { %v112_v7 = vadd.f32 %v146_v5, %v111_v6 }
  0xe4   :  { %v161_v8 = vpop.f32.mrf.mxu0 }
  0xe5   :  { %v117_v10 = vmax.f32 %v112_v7, 0.0 }
  0xe6   :  { %v114_v11 = vpop.f32.mrf.mxu0 }
  0xe7   :  { %v125_v12 = vmul.f32 %v150_v9, %v117_v10 }
  0xe8   :  { %v162_v13 = vpop.f32.mrf.mxu0 }
  0xe9   :  { %v126_v14 = vsel %vm73_vm1, %v125_v12, 0.0 }
  0xea   :  { %127 = vadd.xlane.f32.xlu0 %v126_v14 }
 0x173   :  { %v128_v16 = vpop.xlane.xlu0 %127 }
 0x174   :  { %v131_v17 = vadd.f32 %v130_v15, %v128_v16 }
 0x176   :  { %v151_v18 = vmul.f32 -1.442695, %v131_v17 }
 0x178   :  { %171 = vpow2.f32 %v151_v18 }
 0x185   :  { %v172_v19 = vpop.eup %171 }
 0x186   :  { %v135_v20 = vadd.f32 1.0, %v172_v19 }
 0x188   :  { %173 = vrcp.f32 %v135_v20 }
 0x195   :  { %v174_v21 = vpop.eup %173 }
 0x196   :  { %139 = vst.msk [vmem:[%s278_s5] sm:$0xff] %vm138_vm2, %v174_v21 }
 0x197   :  { %144 = vsyncpa [#allocation4], 1 }
 0x198   :  { %145 = vsyncpa [#allocation6], 1 }

</bundles_post_ra>
